<compile_context>
chip_gen: v7x
topology: tpu7x:2x2x1
jax: 0.10.0
libtpu: 0.0.40
codegen_flags: <defaults>
</compile_context>

<pallas_src>
import functools

import jax
import jax.numpy as jnp
from jax import lax
from jax.experimental import pallas as pl
from jax.experimental.pallas import tpu as pltpu

_VMEM = pl.BlockSpec(memory_space=pltpu.MemorySpace.VMEM)
_SMEM = pl.BlockSpec(memory_space=pltpu.MemorySpace.SMEM)


# ------------------------------ fused kernel ------------------------------- #

def _vat_fused_kernel(xi, eps, ip, L_ref, x_ref, w_ref, d0_ref,
                      lds_ref, logp_ref, d_ref):
    n = x_ref.shape[0]
    inv_n = 1.0 / n

    L = L_ref[...]          # bf16 (cast once in the wrapper), loaded once
    W = w_ref[...]          # bf16
    x = x_ref[...]          # f32 (elementwise pipeline stays f32)

    def logits(xin_f32):
        xin = xin_f32.astype(jnp.bfloat16)
        h = jnp.dot(L, xin, preferred_element_type=jnp.float32)
        return jnp.dot(h.astype(jnp.bfloat16), W,
                       preferred_element_type=jnp.float32)

    def log_softmax_rows(z):
        zs = z - jnp.max(z, axis=-1, keepdims=True)
        return zs - jnp.log(jnp.sum(jnp.exp(zs), axis=-1, keepdims=True))

    def l2_normalize_rows(v):
        ssq = jnp.sum(v * v, axis=-1, keepdims=True)
        return v * lax.rsqrt(ssq + 1e-16)

    # (1) clean forward (torch.no_grad): logp = log_softmax(L @ x @ W)
    logp_ref[...] = log_softmax_rows(logits(x))
    pred = jnp.exp(logp_ref[...])            # reused by every power iteration

    # (2) d = rand(x.shape) - 0.5 ; d = _l2_normalize(d)
    d_ref[...] = l2_normalize_rows(d0_ref[...])

    # (3) power iterations — static python int => fully unrolled so the LLO
    #     scheduler can overlap successive MXU pushes with VPU/EUP work.
    for _ in range(ip):
        xp = x + xi * d_ref[...]
        phat = jnp.exp(log_softmax_rows(logits(xp)))
        gz = (phat - pred) * inv_n                       # d(KL batchmean)/dz
        # L^T @ gz without materializing L^T (contract dim 0 of both operands).
        lt_gz = lax.dot_general(L, gz.astype(jnp.bfloat16),
                                (((0,), (0,)), ((), ())),
                                preferred_element_type=jnp.float32)
        # (L^T @ gz) @ W^T : contract the class dims (MXU-native rhs transpose).
        gxp = lax.dot_general(lt_gz.astype(jnp.bfloat16), W,
                              (((1,), (1,)), ((), ())),
                              preferred_element_type=jnp.float32)
        # grad_d = xi * gxp, but l2-normalize is scale invariant -> drop xi.
        d_ref[...] = l2_normalize_rows(gxp)

    # (4) lds = F.kl_div(log(pred_hat), pred, reduction='batchmean')
    #         = sum( pred * (logp - log_softmax(z_hat)) ) / N
    logp_hat = log_softmax_rows(logits(x + eps * d_ref[...]))
    kl = pred * (logp_ref[...] - logp_hat)
    lds_ref[0] = jnp.sum(kl) * inv_n


# -------------------------------- wrapper ---------------------------------- #

def vat_loss(L, x, W, key, xi=10.0, eps=1.0, ip=1):
    """JAX equivalent of VATLoss(xi, eps, ip).forward(model, x, L, pred)."""
    N, Fdim = x.shape
    C = W.shape[1]

    # torch.rand(x.shape).sub(0.5)  — host-side, passed in as a tiny input.
    d0 = jax.random.uniform(key, x.shape, dtype=jnp.float32) - 0.5

    kernel = functools.partial(_vat_fused_kernel, float(xi), float(eps), int(ip))
    out = pl.pallas_call(
        kernel,
        out_shape=jax.ShapeDtypeStruct((1,), jnp.float32),
        in_specs=[_VMEM, _VMEM, _VMEM, _VMEM],           # L, x, W, d0
        out_specs=_SMEM,                                  # (1,) scalar loss
        scratch_shapes=[
            pltpu.VMEM((N, C), jnp.float32),     # logp  (clean log-probs)
            pltpu.VMEM((N, Fdim), jnp.float32),  # d     (perturbation dir)
        ],
        # Conservative budget so the same plan also fits v7x's 64 MiB VMEM.
        compiler_params=pltpu.CompilerParams(vmem_limit_bytes=48 * 1024 * 1024),
    )(L.astype(jnp.bfloat16), x.astype(jnp.float32),
      W.astype(jnp.bfloat16), d0)
    return out[0]


# ------------------------------ example run -------------------------------- #

if __name__ == "__main__":
    N, F, C = 8, 32, 4  # nodes, features, classes

    key = jax.random.PRNGKey(0)
    k_x, k_adj, k_w, k_d = jax.random.split(key, 4)

    # node features
    x = jax.random.normal(k_x, (N, F), dtype=jnp.float32)

    # deterministic symmetric row-normalised adjacency L (with self-loops)
    a = (jax.random.uniform(k_adj, (N, N)) > 0.6).astype(jnp.float32)
    a = jnp.maximum(a, a.T) + jnp.eye(N, dtype=jnp.float32)
    L = a / jnp.sum(a, axis=-1, keepdims=True)

    # deterministic synthetic "model" weight
    W = 0.1 * jax.random.normal(k_w, (F, C), dtype=jnp.float32)

    lds = vat_loss(L, x, W, k_d, xi=10.0, eps=1.0, ip=1)
    lds = jax.block_until_ready(lds)

    assert lds.shape == () and bool(jnp.isfinite(lds))
    print("KERNEL_OK")
</pallas_src>

<mosaic_0001>
module attributes {stable_mosaic.version = 11 : i64} {
  func.func @_vat_fused_kernel(%arg0: memref<8x8xbf16, #tpu.memory_space<vmem>>, %arg1: memref<8x32xf32, #tpu.memory_space<vmem>>, %arg2: memref<32x4xbf16, #tpu.memory_space<vmem>>, %arg3: memref<8x32xf32, #tpu.memory_space<vmem>>, %arg4: memref<1xf32, #tpu.memory_space<smem>>, %arg5: memref<8x4xf32, #tpu.memory_space<vmem>>, %arg6: memref<8x32xf32, #tpu.memory_space<vmem>>) attributes {dimension_semantics = [], scalar_prefetch = 0 : i64, scratch_operands = 2 : i64, tpu.core_type = #tpu.core_type<tc>} {
    %c0 = arith.constant 0 : index
    %c0_0 = arith.constant 0 : index
    %0 = vector.load %arg0[%c0, %c0_0] : memref<8x8xbf16, #tpu.memory_space<vmem>>, vector<8x8xbf16>
    %c0_1 = arith.constant 0 : index
    %c0_2 = arith.constant 0 : index
    %1 = vector.load %arg2[%c0_1, %c0_2] : memref<32x4xbf16, #tpu.memory_space<vmem>>, vector<32x4xbf16>
    %c0_3 = arith.constant 0 : index
    %c0_4 = arith.constant 0 : index
    %2 = vector.load %arg1[%c0_3, %c0_4] : memref<8x32xf32, #tpu.memory_space<vmem>>, vector<8x32xf32>
    %3 = arith.truncf %2 : vector<8x32xf32> to vector<8x32xbf16>
    %cst = arith.constant dense<0.000000e+00> : vector<8x32xf32>
    %4 = tpu.matmul %0, %3, %cst {dimension_numbers = #tpu.dot_dimension_numbers<[1], [0], [0], [1], [0, 0, 1, 1], [], []>} : vector<8x8xbf16>, vector<8x32xbf16>, vector<8x32xf32> -> vector<8x32xf32>
    %5 = arith.truncf %4 : vector<8x32xf32> to vector<8x32xbf16>
    %cst_5 = arith.constant dense<0.000000e+00> : vector<8x4xf32>
    %6 = tpu.matmul %5, %1, %cst_5 {dimension_numbers = #tpu.dot_dimension_numbers<[1], [0], [0], [1], [0, 0, 1, 1], [], []>} : vector<8x32xbf16>, vector<32x4xbf16>, vector<8x4xf32> -> vector<8x4xf32>
    %cst_6 = arith.constant dense<0xFF800000> : vector<8xf32>
    %7 = vector.multi_reduction <maximumf>, %6, %cst_6 [1] : vector<8x4xf32> to vector<8xf32>
    %8 = vector.shape_cast %7 : vector<8xf32> to vector<8x1xf32>
    %9 = vector.broadcast %8 : vector<8x1xf32> to vector<8x4xf32>
    %10 = arith.subf %6, %9 : vector<8x4xf32>
    %11 = math.exp %10 : vector<8x4xf32>
    %cst_7 = arith.constant dense<0.000000e+00> : vector<8xf32>
    %12 = vector.multi_reduction <add>, %11, %cst_7 [1] : vector<8x4xf32> to vector<8xf32>
    %13 = vector.shape_cast %12 : vector<8xf32> to vector<8x1xf32>
    %14 = math.log %13 : vector<8x1xf32>
    %15 = vector.broadcast %14 : vector<8x1xf32> to vector<8x4xf32>
    %16 = arith.subf %10, %15 : vector<8x4xf32>
    %c0_8 = arith.constant 0 : index
    %c0_9 = arith.constant 0 : index
    %17 = vector.load %arg5[%c0_8, %c0_9] : memref<8x4xf32, #tpu.memory_space<vmem>>, vector<8x4xf32>
    tpu.vector_store %arg5[%c0_8, %c0_9], %16 {strides = array<i32>} : memref<8x4xf32, #tpu.memory_space<vmem>>, vector<8x4xf32>,
    %c0_10 = arith.constant 0 : index
    %c0_11 = arith.constant 0 : index
    %18 = vector.load %arg5[%c0_10, %c0_11] : memref<8x4xf32, #tpu.memory_space<vmem>>, vector<8x4xf32>
    %19 = math.exp %18 : vector<8x4xf32>
    %c0_12 = arith.constant 0 : index
    %c0_13 = arith.constant 0 : index
    %20 = vector.load %arg3[%c0_12, %c0_13] : memref<8x32xf32, #tpu.memory_space<vmem>>, vector<8x32xf32>
    %21 = arith.mulf %20, %20 : vector<8x32xf32>
    %cst_14 = arith.constant dense<0.000000e+00> : vector<8xf32>
    %22 = vector.multi_reduction <add>, %21, %cst_14 [1] : vector<8x32xf32> to vector<8xf32>
    %23 = vector.shape_cast %22 : vector<8xf32> to vector<8x1xf32>
    %cst_15 = arith.constant 1.000000e-16 : f32
    %24 = vector.broadcast %cst_15 : f32 to vector<8x1xf32>
    %25 = arith.addf %23, %24 : vector<8x1xf32>
    %26 = math.rsqrt %25 : vector<8x1xf32>
    %27 = vector.broadcast %26 : vector<8x1xf32> to vector<8x32xf32>
    %28 = arith.mulf %20, %27 : vector<8x32xf32>
    %c0_16 = arith.constant 0 : index
    %c0_17 = arith.constant 0 : index
    %29 = vector.load %arg6[%c0_16, %c0_17] : memref<8x32xf32, #tpu.memory_space<vmem>>, vector<8x32xf32>
    tpu.vector_store %arg6[%c0_16, %c0_17], %28 {strides = array<i32>} : memref<8x32xf32, #tpu.memory_space<vmem>>, vector<8x32xf32>,
    %c0_18 = arith.constant 0 : index
    %c0_19 = arith.constant 0 : index
    %30 = vector.load %arg6[%c0_18, %c0_19] : memref<8x32xf32, #tpu.memory_space<vmem>>, vector<8x32xf32>
    %cst_20 = arith.constant 1.000000e+01 : f32
    %31 = vector.broadcast %cst_20 : f32 to vector<8x32xf32>
    %32 = arith.mulf %31, %30 : vector<8x32xf32>
    %33 = arith.addf %2, %32 : vector<8x32xf32>
    %34 = arith.truncf %33 : vector<8x32xf32> to vector<8x32xbf16>
    %cst_21 = arith.constant dense<0.000000e+00> : vector<8x32xf32>
    %35 = tpu.matmul %0, %34, %cst_21 {dimension_numbers = #tpu.dot_dimension_numbers<[1], [0], [0], [1], [0, 0, 1, 1], [], []>} : vector<8x8xbf16>, vector<8x32xbf16>, vector<8x32xf32> -> vector<8x32xf32>
    %36 = arith.truncf %35 : vector<8x32xf32> to vector<8x32xbf16>
    %cst_22 = arith.constant dense<0.000000e+00> : vector<8x4xf32>
    %37 = tpu.matmul %36, %1, %cst_22 {dimension_numbers = #tpu.dot_dimension_numbers<[1], [0], [0], [1], [0, 0, 1, 1], [], []>} : vector<8x32xbf16>, vector<32x4xbf16>, vector<8x4xf32> -> vector<8x4xf32>
    %cst_23 = arith.constant dense<0xFF800000> : vector<8xf32>
    %38 = vector.multi_reduction <maximumf>, %37, %cst_23 [1] : vector<8x4xf32> to vector<8xf32>
    %39 = vector.shape_cast %38 : vector<8xf32> to vector<8x1xf32>
    %40 = vector.broadcast %39 : vector<8x1xf32> to vector<8x4xf32>
    %41 = arith.subf %37, %40 : vector<8x4xf32>
    %42 = math.exp %41 : vector<8x4xf32>
    %cst_24 = arith.constant dense<0.000000e+00> : vector<8xf32>
    %43 = vector.multi_reduction <add>, %42, %cst_24 [1] : vector<8x4xf32> to vector<8xf32>
    %44 = vector.shape_cast %43 : vector<8xf32> to vector<8x1xf32>
    %45 = math.log %44 : vector<8x1xf32>
    %46 = vector.broadcast %45 : vector<8x1xf32> to vector<8x4xf32>
    %47 = arith.subf %41, %46 : vector<8x4xf32>
    %48 = math.exp %47 : vector<8x4xf32>
    %49 = arith.subf %48, %19 : vector<8x4xf32>
    %cst_25 = arith.constant 1.250000e-01 : f32
    %50 = vector.broadcast %cst_25 : f32 to vector<8x4xf32>
    %51 = arith.mulf %49, %50 : vector<8x4xf32>
    %52 = arith.truncf %51 : vector<8x4xf32> to vector<8x4xbf16>
    %cst_26 = arith.constant dense<0.000000e+00> : vector<8x4xf32>
    %53 = tpu.matmul %0, %52, %cst_26 {dimension_numbers = #tpu.dot_dimension_numbers<[0], [0], [1], [1], [0, 1, 1, 1], [], []>} : vector<8x8xbf16>, vector<8x4xbf16>, vector<8x4xf32> -> vector<8x4xf32>
    %54 = arith.truncf %53 : vector<8x4xf32> to vector<8x4xbf16>
    %cst_27 = arith.constant dense<0.000000e+00> : vector<8x32xf32>
    %55 = tpu.matmul %54, %1, %cst_27 {dimension_numbers = #tpu.dot_dimension_numbers<[1], [1], [0], [0], [0, 0, 1, 0], [], []>} : vector<8x4xbf16>, vector<32x4xbf16>, vector<8x32xf32> -> vector<8x32xf32>
    %56 = arith.mulf %55, %55 : vector<8x32xf32>
    %cst_28 = arith.constant dense<0.000000e+00> : vector<8xf32>
    %57 = vector.multi_reduction <add>, %56, %cst_28 [1] : vector<8x32xf32> to vector<8xf32>
    %58 = vector.shape_cast %57 : vector<8xf32> to vector<8x1xf32>
    %cst_29 = arith.constant 1.000000e-16 : f32
    %59 = vector.broadcast %cst_29 : f32 to vector<8x1xf32>
    %60 = arith.addf %58, %59 : vector<8x1xf32>
    %61 = math.rsqrt %60 : vector<8x1xf32>
    %62 = vector.broadcast %61 : vector<8x1xf32> to vector<8x32xf32>
    %63 = arith.mulf %55, %62 : vector<8x32xf32>
    %c0_30 = arith.constant 0 : index
    %c0_31 = arith.constant 0 : index
    %64 = vector.load %arg6[%c0_30, %c0_31] : memref<8x32xf32, #tpu.memory_space<vmem>>, vector<8x32xf32>
    tpu.vector_store %arg6[%c0_30, %c0_31], %63 {strides = array<i32>} : memref<8x32xf32, #tpu.memory_space<vmem>>, vector<8x32xf32>,
    %c0_32 = arith.constant 0 : index
    %c0_33 = arith.constant 0 : index
    %65 = vector.load %arg6[%c0_32, %c0_33] : memref<8x32xf32, #tpu.memory_space<vmem>>, vector<8x32xf32>
    %cst_34 = arith.constant 1.000000e+00 : f32
    %66 = vector.broadcast %cst_34 : f32 to vector<8x32xf32>
    %67 = arith.mulf %66, %65 : vector<8x32xf32>
    %68 = arith.addf %2, %67 : vector<8x32xf32>
    %69 = arith.truncf %68 : vector<8x32xf32> to vector<8x32xbf16>
    %cst_35 = arith.constant dense<0.000000e+00> : vector<8x32xf32>
    %70 = tpu.matmul %0, %69, %cst_35 {dimension_numbers = #tpu.dot_dimension_numbers<[1], [0], [0], [1], [0, 0, 1, 1], [], []>} : vector<8x8xbf16>, vector<8x32xbf16>, vector<8x32xf32> -> vector<8x32xf32>
    %71 = arith.truncf %70 : vector<8x32xf32> to vector<8x32xbf16>
    %cst_36 = arith.constant dense<0.000000e+00> : vector<8x4xf32>
    %72 = tpu.matmul %71, %1, %cst_36 {dimension_numbers = #tpu.dot_dimension_numbers<[1], [0], [0], [1], [0, 0, 1, 1], [], []>} : vector<8x32xbf16>, vector<32x4xbf16>, vector<8x4xf32> -> vector<8x4xf32>
    %cst_37 = arith.constant dense<0xFF800000> : vector<8xf32>
    %73 = vector.multi_reduction <maximumf>, %72, %cst_37 [1] : vector<8x4xf32> to vector<8xf32>
    %74 = vector.shape_cast %73 : vector<8xf32> to vector<8x1xf32>
    %75 = vector.broadcast %74 : vector<8x1xf32> to vector<8x4xf32>
    %76 = arith.subf %72, %75 : vector<8x4xf32>
    %77 = math.exp %76 : vector<8x4xf32>
    %cst_38 = arith.constant dense<0.000000e+00> : vector<8xf32>
    %78 = vector.multi_reduction <add>, %77, %cst_38 [1] : vector<8x4xf32> to vector<8xf32>
    %79 = vector.shape_cast %78 : vector<8xf32> to vector<8x1xf32>
    %80 = math.log %79 : vector<8x1xf32>
    %81 = vector.broadcast %80 : vector<8x1xf32> to vector<8x4xf32>
    %82 = arith.subf %76, %81 : vector<8x4xf32>
    %c0_39 = arith.constant 0 : index
    %c0_40 = arith.constant 0 : index
    %83 = vector.load %arg5[%c0_39, %c0_40] : memref<8x4xf32, #tpu.memory_space<vmem>>, vector<8x4xf32>
    %84 = arith.subf %83, %82 : vector<8x4xf32>
    %85 = arith.mulf %19, %84 : vector<8x4xf32>
    %86 = vector.shape_cast %85 : vector<8x4xf32> to vector<1x8x4xf32>
    %cst_41 = arith.constant dense<0.000000e+00> : vector<1xf32>
    %87 = vector.multi_reduction <add>, %86, %cst_41 [1, 2] : vector<1x8x4xf32> to vector<1xf32>
    %88 = vector.shape_cast %87 : vector<1xf32> to vector<1x1x1xf32>
    %89 = vector.extract %88[0, 0, 0] : f32 from vector<1x1x1xf32>
    %cst_42 = arith.constant 1.250000e-01 : f32
    %90 = arith.mulf %89, %cst_42 : f32
    %c0_43 = arith.constant 0 : index
    %91 = memref.load %arg4[%c0_43] : memref<1xf32, #tpu.memory_space<smem>>
    memref.store %90, %arg4[%c0_43] : memref<1xf32, #tpu.memory_space<smem>>
    return
  }
}

</mosaic_0001>

<bundles_post_ra>
// kernel: tpu_custom_call.1
= control target key start
LH: loop header
LB: loop body
LE: loop exit
PB: predicated region body
PF: predicated region fallthrough
CT: control target
= control target key end

     0   :  { %9 = vsyncpa [#allocation5], 0  ;;  %s831_s0 = inlined_call_operand.hbm [shape: bf16[8,8], index: 0, kind: input, shape index: {}]   ;;  %s832_s1 = inlined_call_operand.vmem [shape: f32[8,32], index: 1, kind: input, shape index: {}]   ;;  %s833_s2 = inlined_call_operand.vmem [shape: bf16[32,4], index: 2, kind: input, shape index: {}]   ;;  %s834_s3 = inlined_call_operand.vmem [shape: f32[8,32], index: 3, kind: input, shape index: {}]   ;;  %s835_s4 = inlined_call_operand.hbm [shape: f32[1], index: 4, kind: output, shape index: {}]  }
   0x1   :  { %10 = vsyncpa [#allocation6], 0  ;;  %s680_s15 = smov [#allocation4]   ;;  %s644_s19 = scalar_lea.hbm %s831_s0, 64 }
   0x2   :  { %s17_s16 = sshll.u32 %s680_s15, 4  ;;  %p645_p0 = scmp.ne.s32.totalorder %s831_s0, %s644_s19  ;;  %s18_s16 = int_to_ptr.vmem [resolvable:$true] %s17_s16 }
   0x3   :  { %p648_p1 = scmp.lt.u32.totalorder %s644_s19, %s831_s0 }
   0x5   :  { %p650_p2 = pnand %p648_p1, %p645_p0 }
   0x7   :  { %653 = shalt.err (!%p650_p2)
}
   0x8   :  { %s654_s24 = scalar_lea.vmem %s18_s16, 64  ;;  %p659_p4 = scmp.lt.s32.totalorder %s18_s16, %s18_s16 }
   0x9   :  { %p655_p3 = scmp.ne.s32.totalorder %s18_s16, %s654_s24  ;;  %p660_p5 = scmp.lt.s32.totalorder %s654_s24, %s654_s24 }
   0xb   :  { %p661_p6 = por %p660_p5, %p659_p4 }
   0xd   :  { %p662_p7 = pnand %p661_p6, %p655_p3 }
   0xf   :  { %665 = shalt.err (!%p662_p7)
}
  0x10   :  { %20 = dma.hbm_to_vmem [thread:$0]  %s831_s0, 64, %s18_s16, [#allocation5]  }
  0x11   :  { %676 = dma.done.wait [#allocation5], 64  }
  0x12   :  { %677 = vsyncadd [#allocation5], 4294967232  ;;  %v681_v0 = vmov 0.0   ;;  %vm682_vm0 = vmmov 0   ;;  %vm99_vm1 = vcmask 261120   ;;  %v160_v1 = vld [vmem:[%s834_s3] sm:$0xff] }
  0x13   :  { %559 = vmatprep.subr.bf16.mxu0 %v681_v0  ;;  %561 = vmatprep.mubr.msk.bf16.mxu0 %vm682_vm0, %v681_v0  ;;  %v733_v2 = vld [vmem:[%s832_s1] sm:$0xff]  ;;  %vm42_vm2 = vcmask 1043456   ;;  %v161_v3 = vmul.f32 %v160_v1, %v160_v1  ;;  %v739_v7 = vld [vmem:[#allocation4] sm:$0xf]  ;;  %vm38_vm3 = vcmask 64512   ;;  %v756_v9 = vld [vmem:[%s833_s2 + $0x8] sm:$0xff]  }
  0x14   :  { %565 = vmatprep.subr.bf16.mxu1 %v681_v0  ;;  %569 = vmatprep.mubr.msk.bf16.mxu1 %vm682_vm0, %v681_v0  ;;  %v37_v4 = vpack.c.bf16 %v733_v2, %v733_v2  ;;  %v749_v8 = vld [vmem:[%s833_s2] sm:$0xff]   ;;  %vm143_vm4 = vcmask 31744   ;;  %s666_s9 = scalar_lea.hbm %s835_s4, 16 }
  0x15   :  { %v162_v5 = vsel %vm99_vm1, %v161_v3, 0.0  ;;  %566 = vmatpush3.bf16.msra.mxu1 %v749_v8  ;;  %v344_v53 = vsel %vm143_vm4, %v749_v8, 0  ;;  %v347_v54 = vsel %vm143_vm4, %v756_v9, 0  ;;  %p667_p8 = scmp.ne.s32.totalorder %s835_s4, %s666_s9  ;;  %p670_p9 = scmp.lt.u32.totalorder %s666_s9, %s835_s4 }
  0x16   :  { %v44_v6 = vsel %vm42_vm2, %v37_v4, 0  ;;  %163 = vadd.xlane.f32.xlu0 %v162_v5  ;;  %567 = vmatprep.subr.bf16.mxu1 %v681_v0 }
  0x17   :  { %560 = vmatpush3.bf16.msra.mxu0 %v44_v6  ;;  %p672_p10 = pnand %p670_p9, %p667_p8 }
  0x18   :  { %573 = vmatprep.subr.bf16.mxu0 %v681_v0 }
  0x19   :  { %568 = vmatpush3.bf16.msra.mxu1 %v756_v9 }
  0x1a   :  { %562 = vmatmul.mubr.msk.bf16.vlgmr.msra.gmra.mrb[0].mxu0 %vm38_vm3, %v739_v7  ;;  %579 = vmatprep.subr.bf16.mxu1 %v681_v0 }
  0x1b   :  { %575 = vmatprep.mubr.msk.bf16.mxu0 %vm682_vm0, %v681_v0 }
  0xa3   :  { %v164_v10 = vpop.xlane.xlu0 %163 }
  0xa4   :  { %v165_v11 = vadd.f32 1e-16, %v164_v10 }
  0xa6   :  { %624 = vrsqrt.f32 %v165_v11 }
  0xb0   :  { %v625_v12 = vpop.eup %624 }
  0xb1   :  { %v167_v13 = vmul.f32 %v625_v12, %v160_v1 }
  0xb3   :  { %168 = vst.msk [vmem:[#allocation3] sm:$0xff] %vm99_vm1, %v167_v13 }
  0xba   :  { %v169_v14 = vld [vmem:[#allocation3] sm:$0xff] }
  0xbb   :  { %v170_v15 = vmul.f32 10.0, %v169_v14 }
  0xbd   :  { %v171_v16 = vadd.f32 %v170_v15, %v733_v2 }
  0xbf   :  { %v172_v17 = vpack.c.bf16 %v171_v16, %v171_v16 }
  0xc1   :  { %v174_v18 = vsel %vm42_vm2, %v172_v17, 0 }
  0xc2   :  { %574 = vmatpush3.bf16.msra.mxu0 %v174_v18 }
  0xc3   :  { %587 = vmatprep.subr.bf16.mxu0 %v681_v0 }
  0xc5   :  { %576 = vmatmul.mubr.msk.bf16.vlgmr.msra.gmra.mrb[4].mxu0 %vm38_vm3, %v739_v7 }
  0xc6   :  { %589 = vmatprep.mubr.msk.bf16.mxu0 %vm682_vm0, %v681_v0 }
  0xed   :  { %v80_v19 = vpop.f32.mrb[0].mxu0 }
  0xee   :  { %v86_v20 = vpack.c.bf16 %v80_v19, %v80_v19  ;;  %v563_v21 = vpop.f32.mrb[1].mxu0 }
  0xef   :  { %v83_v22 = vpop.f32.mrb[2].mxu0 }
  0xf0   :  { %570 = vmatmul.mubr.msk.bf16.vlgmr.msra.gmra.mrb[0].mxu1 %vm99_vm1, %v86_v20  ;;  %v564_v23 = vpop.f32.mrb[3].mxu0 }
  0xf1   :  { %580 = vmatpush3.bf16.msra.mxu1 %v749_v8  ;;  %583 = vmatprep.mubr.msk.bf16.mxu1 %vm682_vm0, %v681_v0 }
  0xf2   :  { %581 = vmatprep.subr.bf16.mxu1 %v681_v0 }
  0xf5   :  { %582 = vmatpush3.bf16.msra.mxu1 %v756_v9 }
  0xf6   :  { %593 = vmatprep.subr.bf16.mxu1 %v681_v0 }
 0x198   :  { %v210_v24 = vpop.f32.mrb[4].mxu0 }
 0x199   :  { %v216_v25 = vpack.c.bf16 %v210_v24, %v210_v24  ;;  %v577_v26 = vpop.f32.mrb[5].mxu0 }
 0x19a   :  { %v213_v27 = vpop.f32.mrb[6].mxu0 }
 0x19b   :  { %v578_v28 = vpop.f32.mrb[7].mxu0  ;;  %584 = vmatmul.mubr.msk.bf16.vlgmr.msra.gmra.mrb[4].mxu1 %vm99_vm1, %v216_v25 }
 0x19c   :  { %597 = vmatprep.mubr.msk.bf16.mxu1 %vm682_vm0, %v681_v0  ;;  %594 = vmatpush3.bf16.xpose.msra.mxu1 %v344_v53 }
 0x19d   :  { %595 = vmatprep.subr.bf16.mxu1 %v681_v0 }
 0x1a4   :  { %596 = vmatpush3.bf16.xpose.msra.mxu1 %v347_v54 }
 0x1c3   :  { %v137_v29 = vpop.f32.mrb[0].mxu1 }
 0x1c4   :  { %v144_v30 = vsel %vm143_vm4, %v137_v29, -inf  ;;  %v571_v31 = vpop.f32.mrb[1].mxu1 }
 0x1c5   :  { %145 = vmax.xlane.f32.xlu0 %v144_v30  ;;  %v140_v32 = vpop.f32.mrb[2].mxu1 }
 0x1c6   :  { %v572_v33 = vpop.f32.mrb[3].mxu1 }
 0x252   :  { %v146_v34 = vpop.xlane.xlu0 %145 }
 0x253   :  { %v147_v35 = vsub.f32 %v137_v29, %v146_v34 }
 0x255   :  { %v148_v36 = vmul.f32 1.442695, %v147_v35 }
 0x257   :  { %626 = vpow2.f32 %v148_v36 }
 0x261   :  { %v627_v37 = vpop.eup %626 }
 0x262   :  { %v150_v43 = vsel %vm143_vm4, %v627_v37, 0.0 }
 0x26e   :  { %v254_v38 = vpop.f32.mrb[4].mxu1 }
 0x26f   :  { %v585_v39 = vpop.f32.mrb[5].mxu1  ;;  %v260_v40 = vsel %vm143_vm4, %v254_v38, -inf }
 0x270   :  { %261 = vmax.xlane.f32.xlu1 %v260_v40  ;;  %v257_v41 = vpop.f32.mrb[6].mxu1 }
 0x271   :  { %v586_v42 = vpop.f32.mrb[7].mxu1 }
 0x274   :  { %151 = vadd.xlane.f32.xlu1 %v150_v43 }
 0x2a1   :  { %277 = vxpose.xlu1.c.b16.start.end [1/1] (short) (narrow) %v739_v7, 16 }
 0x2fd   :  { %v262_v44 = vpop.xlane.xlu1 %261 }
 0x2fe   :  { %v263_v45 = vsub.f32 %v254_v38, %v262_v44 }
 0x300   :  { %v264_v46 = vmul.f32 1.442695, %v263_v45 }
 0x301   :  { %v152_v47 = vpop.xlane.xlu1 %151 }
 0x302   :  { %628 = vpow2.f32 %v264_v46 }
 0x303   :  { %630 = vlog2.f32 %v152_v47 }
 0x307   :  { %v285_v6 = vpop.trf.xlu1 }
 0x30c   :  { %v629_v48 = vpop.eup %628 }
 0x30d   :  { %v631_v49 = vpop.eup %630  ;;  %v266_v50 = vsel %vm143_vm4, %v629_v48, 0.0 }
 0x30e   :  { %v154_v51 = vmul.f32 0.6931472, %v631_v49  ;;  %267 = vadd.xlane.f32.xlu0 %v266_v50 }
 0x310   :  { %v155_v52 = vsub.f32 %v147_v35, %v154_v51 }
 0x312   :  { %156 = vst.msk [vmem:[#allocation2] sm:$0xff] %vm143_vm4, %v155_v52 }
 0x319   :  { %v789_v56 = vld [vmem:[#allocation2] sm:$0xff] }
 0x31a   :  { %v158_v59 = vmul.f32 1.442695, %v789_v56 }
 0x39b   :  { %v268_v55 = vpop.xlane.xlu0 %267 }
 0x39c   :  { %632 = vlog2.f32 %v268_v55 }
 0x39d   :  { %634 = vpow2.f32 %v158_v59 }
 0x3a6   :  { %v633_v57 = vpop.eup %632 }
 0x3a7   :  { %v270_v58 = vmul.f32 0.6931472, %v633_v57  ;;  %v792_v62 = vpop.eup %634 }
 0x3a9   :  { %v271_v60 = vsub.f32 %v263_v45, %v270_v58 }
 0x3ab   :  { %v272_v61 = vmul.f32 1.442695, %v271_v60 }
 0x3ad   :  { %636 = vpow2.f32 %v272_v61 }
 0x3b7   :  { %v637_v63 = vpop.eup %636 }
 0x3b8   :  { %v274_v1 = vsub.f32 %v637_v63, %v792_v62 }
 0x3ba   :  { %v275_v3 = vmul.f32 0.125, %v274_v1 }
 0x3bc   :  { %v276_v4 = vpack.c.bf16 %v275_v3, %v275_v3 }
 0x3be   :  { %v297_v5 = vsel %vm42_vm2, %v276_v4, 0 }
 0x3bf   :  { %588 = vmatpush3.bf16.msra.mxu0 %v297_v5 }
 0x3c0   :  { %601 = vmatprep.subr.bf16.mxu0 %v681_v0 }
 0x3c2   :  { %590 = vmatmul.mubr.msk.bf16.vlgmr.msra.gmra.mrb[8].mxu0 %vm38_vm3, %v285_v6 }
 0x3c3   :  { %603 = vmatprep.mubr.msk.bf16.mxu0 %vm682_vm0, %v681_v0 }
 0x495   :  { %v333_v10 = vpop.f32.mrb[8].mxu0 }
 0x496   :  { %v339_v11 = vpack.c.bf16 %v333_v10, %v333_v10  ;;  %v591_v12 = vpop.f32.mrb[9].mxu0 }
 0x497   :  { %v336_v13 = vpop.f32.mrb[10].mxu0 }
 0x498   :  { %v592_v14 = vpop.f32.mrb[11].mxu0  ;;  %598 = vmatmul.mubr.msk.bf16.vlgmr.msra.gmra.mrb[8].mxu1 %vm143_vm4, %v339_v11 }
 0x56b   :  { %v383_v15 = vpop.f32.mrb[8].mxu1 }
 0x56c   :  { %v389_v16 = vmul.f32 %v383_v15, %v383_v15  ;;  %v599_v17 = vpop.f32.mrb[9].mxu1 }
 0x56d   :  { %v386_v18 = vpop.f32.mrb[10].mxu1 }
 0x56e   :  { %v600_v19 = vpop.f32.mrb[11].mxu1  ;;  %v390_v20 = vsel %vm99_vm1, %v389_v16, 0.0 }
 0x56f   :  { %391 = vadd.xlane.f32.xlu0 %v390_v20 }
 0x5fc   :  { %v392_v21 = vpop.xlane.xlu0 %391 }
 0x5fd   :  { %v393_v22 = vadd.f32 1e-16, %v392_v21 }
 0x5ff   :  { %638 = vrsqrt.f32 %v393_v22 }
 0x609   :  { %v639_v23 = vpop.eup %638 }
 0x60a   :  { %v395_v24 = vmul.f32 %v639_v23, %v383_v15 }
 0x60c   :  { %396 = vst.msk [vmem:[#allocation3] sm:$0xff] %vm99_vm1, %v395_v24 }
 0x613   :  { %v397_v25 = vld [vmem:[#allocation3] sm:$0xff] }
 0x614   :  { %v398_v26 = vadd.f32 %v397_v25, %v733_v2 }
 0x616   :  { %v399_v27 = vpack.c.bf16 %v398_v26, %v398_v26 }
 0x618   :  { %v401_v28 = vsel %vm42_vm2, %v399_v27, 0 }
 0x619   :  { %602 = vmatpush3.bf16.msra.mxu0 %v401_v28 }
 0x61a   :  { %607 = vmatprep.subr.bf16.mxu0 %v681_v0 }
 0x61c   :  { %604 = vmatmul.mubr.msk.bf16.vlgmr.msra.gmra.mrb[12].mxu0 %vm38_vm3, %v739_v7 }
 0x61d   :  { %608 = vmatpush3.bf16.msra.mxu0 %v749_v8  ;;  %611 = vmatprep.mubr.msk.bf16.mxu0 %vm682_vm0, %v681_v0 }
 0x61e   :  { %609 = vmatprep.subr.bf16.mxu0 %v681_v0 }
 0x621   :  { %610 = vmatpush3.bf16.msra.mxu0 %v756_v9 }
 0x6ef   :  { %v437_v29 = vpop.f32.mrb[12].mxu0 }
 0x6f0   :  { %v443_v2 = vpack.c.bf16 %v437_v29, %v437_v29  ;;  %v605_v30 = vpop.f32.mrb[13].mxu0 }
 0x6f1   :  { %v440_v31 = vpop.f32.mrb[14].mxu0 }
 0x6f2   :  { %612 = vmatmul.mubr.msk.bf16.vlgmr.msra.gmra.mrb[16].mxu0 %vm99_vm1, %v443_v2  ;;  %v606_v32 = vpop.f32.mrb[15].mxu0 }
 0x7c5   :  { %v481_v33 = vpop.f32.mrb[16].mxu0 }
 0x7c6   :  { %v487_v34 = vsel %vm143_vm4, %v481_v33, -inf  ;;  %v613_v7 = vpop.f32.mrb[17].mxu0 }
 0x7c7   :  { %488 = vmax.xlane.f32.xlu0 %v487_v34  ;;  %v484_v8 = vpop.f32.mrb[18].mxu0 }
 0x7c8   :  { %v614_v35 = vpop.f32.mrb[19].mxu0 }
 0x854   :  { %v489_v36 = vpop.xlane.xlu0 %488 }
 0x855   :  { %v490_v37 = vsub.f32 %v481_v33, %v489_v36 }
 0x857   :  { %v491_v38 = vmul.f32 1.442695, %v490_v37 }
 0x859   :  { %640 = vpow2.f32 %v491_v38 }
 0x863   :  { %v641_v0 = vpop.eup %640 }
 0x864   :  { %v493_v9 = vsel %vm143_vm4, %v641_v0, 0.0 }
 0x865   :  { %494 = vadd.xlane.f32.xlu0 %v493_v9 }
 0x8f2   :  { %v495_v39 = vpop.xlane.xlu0 %494 }
 0x8f3   :  { %642 = vlog2.f32 %v495_v39 }
 0x8fd   :  { %v643_v40 = vpop.eup %642 }
 0x8fe   :  { %v497_v41 = vmul.f32 0.6931472, %v643_v40 }
 0x900   :  { %v498_v42 = vsub.f32 %v490_v37, %v497_v41 }
 0x902   :  { %v500_v43 = vsub.f32 %v789_v56, %v498_v42 }
 0x904   :  { %v501_v44 = vmul.f32 %v792_v62, %v500_v43 }
 0x906   :  { %v502_v45 = vsel %vm143_vm4, %v501_v44, 0.0 }
 0x907   :  { %503 = vadd.xlane.f32.xlu0 %v502_v45 }
 0x994   :  { %v504_v46 = vpop.xlane.xlu0 %503 }
 0x995   :  { %v505_v47 = vrot.slane %v504_v46, 4 }
 0x997   :  { %v506_v48 = vadd.f32 %v505_v47, %v504_v46 }
 0x999   :  { %v507_v49 = vrot.slane %v506_v48, 2 }
 0x99b   :  { %v508_v50 = vadd.f32 %v507_v49, %v506_v48 }
 0x99d   :  { %v509_v51 = vrot.slane %v508_v50, 1 }
 0x99f   :  { %v510_v52 = vadd.f32 %v509_v51, %v508_v50 }
 0x9a1   :  { %615 = vpush %v510_v52 }
 0x9d2   :  { %s616_s2 = spop %615 }
 0x9d3   :  { %s512_s6 = smul.f32 0.125, %s616_s2 }
 0x9d5   :  { %514 = sst [smem:[#allocation7]] %s512_s6 }
 0x9d6   :  { %675 = shalt.err (!%p672_p10)
}
 0x9d7   :  { %s683_s14 = smov [#allocation7]  }
 0x9d8   :  { %522 = dma.smem_to_hbm %s683_s14, 16, %s835_s4, [#allocation6]  }
 0x9d9   :  { %678 = dma.done.wait [#allocation6], 16  }
 0x9da   :  { %679 = vsyncadd [#allocation6], 4294967280 }
 0x9db   :  { %526 = sfence }
 0x9dc   :  { %527 = vsyncpa [#allocation5], 1 }
 0x9dd   :  { %528 = vsyncpa [#allocation6], 1 }

</bundles_post_ra>
